<compile_context>
chip_gen: v6e
topology: v6e:2x2x1
jax: 0.10.0
libtpu: 0.0.40
codegen_flags: <defaults>
</compile_context>

<pallas_src>
import functools

import jax
import jax.numpy as jnp
from jax.experimental import pallas as pl
from jax.experimental.pallas import tpu as pltpu


def _gelu_new(x):
    # GPT-2 "gelu_new": 0.5 * x * (1 + tanh(sqrt(2/pi) * (x + 0.044715 * x^3)))
    # Rewritten as x * (1 + 0.044715*x*x) to save one VALU multiply per element.
    c = 0.7978845608028654  # sqrt(2 / pi)
    inner = x * (1.0 + 0.044715 * (x * x))
    return 0.5 * x * (1.0 + jnp.tanh(c * inner))


def gpt2_mlp_kernel(x_ref, wfc_ref, bfc_ref, wproj_ref, bproj_ref, o_ref, acc_ref):
    """One (token-tile i, intermediate-chunk k) grid step.

    x_ref    : [tm, H]      token tile (same tile for every k)
    wfc_ref  : [H, ti]      k-th column chunk of c_fc weight
    bfc_ref  : [1, ti]      k-th chunk of c_fc bias
    wproj_ref: [ti, H]      k-th row chunk of c_proj weight
    bproj_ref: [1, H]       full c_proj bias
    o_ref    : [tm, H]      output tile (resident across k)
    acc_ref  : [tm, H] f32  accumulator scratch (resident across k)
    """
    k = pl.program_id(1)

    @pl.when(k == 0)
    def _():
        acc_ref[...] = jnp.zeros_like(acc_ref)

    # First projection chunk: [tm, H] @ [H, ti] -> [tm, ti]  (MXU, f32 accumulation)
    x = x_ref[...].astype(wfc_ref.dtype)
    h = jnp.dot(x, wfc_ref[...], preferred_element_type=jnp.float32)
    h = h + bfc_ref[...].astype(jnp.float32)          # bias broadcast over tokens
    a = _gelu_new(h)                                  # f32 elementwise (VPU + EUP tanh)

    # Second projection chunk: [tm, ti] @ [ti, H] -> accumulate into [tm, H]
    acc_ref[...] += jnp.dot(a.astype(wproj_ref.dtype), wproj_ref[...],
                            preferred_element_type=jnp.float32)

    @pl.when(k == pl.num_programs(1) - 1)
    def _():
        out = acc_ref[...] + bproj_ref[...].astype(jnp.float32)
        o_ref[...] = out.astype(o_ref.dtype)


def _pick_ti(intermediate):
    # Largest MXU-friendly chunk of the intermediate dim that divides it.
    for cand in (512, 256, 128):
        if intermediate % cand == 0:
            return cand
    return intermediate  # small / odd sizes: take the whole thing


def gpt2_mlp(x, w_fc, b_fc, w_proj, b_proj, *, tm=None, ti=None):
    """x: [T, H]; w_fc: [H, I]; b_fc: [1, I]; w_proj: [I, H]; b_proj: [1, H]."""
    T, H = x.shape
    I = w_fc.shape[1]
    assert w_fc.shape == (H, I)
    assert w_proj.shape == (I, H)
    assert b_fc.shape == (1, I)
    assert b_proj.shape == (1, H)

    if ti is None:
        ti = _pick_ti(I)
    assert I % ti == 0, f"ti={ti} must divide intermediate size {I}"
    nk = I // ti

    if tm is None:
        # MXU-shaped token tile for real prefill; round small T up to sublane granule.
        tm = 256 if T >= 256 else max(8, ((T + 7) // 8) * 8)

    # Pad the token axis so the grid is exact; rows are independent, so zero-padding
    # is correct and the pad rows are sliced away afterwards.
    Tp = ((T + tm - 1) // tm) * tm
    x_in = jnp.pad(x, ((0, Tp - T), (0, 0))) if Tp != T else x
    nt = Tp // tm

    bytes_accessed = (
        x.size * x.dtype.itemsize
        + w_fc.size * w_fc.dtype.itemsize
        + w_proj.size * w_proj.dtype.itemsize
        + b_fc.size * b_fc.dtype.itemsize
        + b_proj.size * b_proj.dtype.itemsize
        + T * H * x.dtype.itemsize
    )
    cost = pl.CostEstimate(
        flops=4 * T * H * I,          # two matmuls, 2*T*H*I each
        transcendentals=T * I,        # tanh in gelu_new
        bytes_accessed=bytes_accessed,
    )

    out = pl.pallas_call(
        gpt2_mlp_kernel,
        out_shape=jax.ShapeDtypeStruct((Tp, H), x.dtype),
        grid_spec=pltpu.PrefetchScalarGridSpec(
            num_scalar_prefetch=0,
            grid=(nt, nk),  # (token tiles [parallel], I-reduction [arbitrary], last)
            in_specs=[
                pl.BlockSpec((tm, H), lambda i, k: (i, 0)),   # x: per-token tile
                pl.BlockSpec((H, ti), lambda i, k: (0, k)),   # w_fc: streamed col chunks
                pl.BlockSpec((1, ti), lambda i, k: (0, k)),   # b_fc: streamed chunks
                pl.BlockSpec((ti, H), lambda i, k: (k, 0)),   # w_proj: streamed row chunks
                pl.BlockSpec((1, H), lambda i, k: (0, 0)),    # b_proj: resident
            ],
            # Output block index independent of k -> tile stays resident across the
            # reduction; written back to HBM once per token tile.
            out_specs=pl.BlockSpec((tm, H), lambda i, k: (i, 0)),
            scratch_shapes=[pltpu.VMEM((tm, H), jnp.float32)],
        ),
        compiler_params=pltpu.CompilerParams(
            dimension_semantics=("parallel", "arbitrary"),
        ),
        cost_estimate=cost,
        # TODO(synk): on v5e, if weight DMA is exposed at small T, add
        # pipeline_mode=pl.Buffered(3) to the streamed w_fc/w_proj BlockSpecs.
    )(x_in, w_fc, b_fc, w_proj, b_proj)

    return out[:T] if Tp != T else out


def reference_mlp(x, w_fc, b_fc, w_proj, b_proj):
    h = x.astype(jnp.float32) @ w_fc.astype(jnp.float32) + b_fc.astype(jnp.float32)
    a = _gelu_new(h)
    out = a @ w_proj.astype(jnp.float32) + b_proj.astype(jnp.float32)
    return out.astype(x.dtype)


if __name__ == "__main__":
    # Small GPT-2-like config: hidden_size=32, intermediate_size=256, num_tokens=16
    # (flattened batch*seq). Tiles chosen so both grid axes have >1 step:
    # tm=8 -> 2 token tiles, ti=128 -> 2 intermediate chunks.
    T, H = 16, 32
    I = 8 * H  # 256

    key = jax.random.PRNGKey(0)
    kx, k1, k2, k3, k4 = jax.random.split(key, 5)

    x = jax.random.normal(kx, (T, H), dtype=jnp.float32)
    w_fc = jax.random.normal(k1, (H, I), dtype=jnp.float32) * 0.02
    b_fc = jax.random.normal(k2, (1, I), dtype=jnp.float32) * 0.02
    w_proj = jax.random.normal(k3, (I, H), dtype=jnp.float32) * 0.02
    b_proj = jax.random.normal(k4, (1, H), dtype=jnp.float32) * 0.02

    out = gpt2_mlp(x, w_fc, b_fc, w_proj, b_proj, tm=8, ti=128)
    out = jax.block_until_ready(out)

    ref = reference_mlp(x, w_fc, b_fc, w_proj, b_proj)
    assert out.shape == (T, H)
    assert jnp.allclose(out, ref, atol=1e-4, rtol=1e-4), "mismatch vs reference"

    print("KERNEL_OK")
</pallas_src>

<mosaic_0001>
module attributes {stable_mosaic.version = 11 : i64} {
  func.func @gpt2_mlp_kernel(%arg0: i32, %arg1: i32, %arg2: memref<8x32xf32, #tpu.memory_space<vmem>>, %arg3: memref<32x128xf32, #tpu.memory_space<vmem>>, %arg4: memref<1x128xf32, #tpu.memory_space<vmem>>, %arg5: memref<128x32xf32, #tpu.memory_space<vmem>>, %arg6: memref<1x32xf32, #tpu.memory_space<vmem>>, %arg7: memref<8x32xf32, #tpu.memory_space<vmem>>, %arg8: memref<8x32xf32, #tpu.memory_space<vmem>>) attributes {dimension_semantics = [#tpu.dimension_semantics<parallel>, #tpu.dimension_semantics<arbitrary>], iteration_bounds = array<i64: 2, 2>, scalar_prefetch = 0 : i64, scratch_operands = 1 : i64, tpu.core_type = #tpu.core_type<tc>, window_params = [{transform_indices = @transform_0, window_bounds = array<i64: 8, 32>}, {transform_indices = @transform_1, window_bounds = array<i64: 32, 128>}, {transform_indices = @transform_2, window_bounds = array<i64: 1, 128>}, {transform_indices = @transform_3, window_bounds = array<i64: 128, 32>}, {pipeline_mode = #tpu.pipeline_mode<synchronous>, transform_indices = @transform_4, window_bounds = array<i64: 1, 32>}, {transform_indices = @transform_5, window_bounds = array<i64: 8, 32>}]} {
    %c0_i32 = arith.constant 0 : i32
    %0 = arith.cmpi eq, %arg1, %c0_i32 : i32
    %1 = arith.extui %0 : i1 to i32
    %c0_i32_0 = arith.constant 0 : i32
    %2 = arith.cmpi ne, %1, %c0_i32_0 : i32
    scf.if %2 {
      %cst_19 = arith.constant 0.000000e+00 : f32
      %31 = vector.broadcast %cst_19 : f32 to vector<8x32xf32>
      %c0_20 = arith.constant 0 : index
      %c0_21 = arith.constant 0 : index
      %32 = vector.load %arg8[%c0_20, %c0_21] : memref<8x32xf32, #tpu.memory_space<vmem>>, vector<8x32xf32>
      tpu.vector_store %arg8[%c0_20, %c0_21], %31 {strides = array<i32>} : memref<8x32xf32, #tpu.memory_space<vmem>>, vector<8x32xf32>,
    } else {
    }
    %c0 = arith.constant 0 : index
    %c0_1 = arith.constant 0 : index
    %3 = vector.load %arg2[%c0, %c0_1] : memref<8x32xf32, #tpu.memory_space<vmem>>, vector<8x32xf32>
    %c0_2 = arith.constant 0 : index
    %c0_3 = arith.constant 0 : index
    %4 = vector.load %arg3[%c0_2, %c0_3] : memref<32x128xf32, #tpu.memory_space<vmem>>, vector<32x128xf32>
    %cst = arith.constant dense<0.000000e+00> : vector<8x128xf32>
    %5 = tpu.matmul %3, %4, %cst {dimension_numbers = #tpu.dot_dimension_numbers<[1], [0], [0], [1], [0, 0, 1, 1], [], []>} : vector<8x32xf32>, vector<32x128xf32>, vector<8x128xf32> -> vector<8x128xf32>
    %c0_4 = arith.constant 0 : index
    %c0_5 = arith.constant 0 : index
    %6 = vector.load %arg4[%c0_4, %c0_5] : memref<1x128xf32, #tpu.memory_space<vmem>>, vector<1x128xf32>
    %7 = vector.broadcast %6 : vector<1x128xf32> to vector<8x128xf32>
    %8 = arith.addf %5, %7 : vector<8x128xf32>
    %9 = arith.mulf %8, %8 : vector<8x128xf32>
    %cst_6 = arith.constant 4.471500e-02 : f32
    %10 = vector.broadcast %cst_6 : f32 to vector<8x128xf32>
    %11 = arith.mulf %10, %9 : vector<8x128xf32>
    %cst_7 = arith.constant 1.000000e+00 : f32
    %12 = vector.broadcast %cst_7 : f32 to vector<8x128xf32>
    %13 = arith.addf %12, %11 : vector<8x128xf32>
    %14 = arith.mulf %8, %13 : vector<8x128xf32>
    %cst_8 = arith.constant 5.000000e-01 : f32
    %15 = vector.broadcast %cst_8 : f32 to vector<8x128xf32>
    %16 = arith.mulf %15, %8 : vector<8x128xf32>
    %cst_9 = arith.constant 0.797884583 : f32
    %17 = vector.broadcast %cst_9 : f32 to vector<8x128xf32>
    %18 = arith.mulf %17, %14 : vector<8x128xf32>
    %19 = math.tanh %18 : vector<8x128xf32>
    %cst_10 = arith.constant 1.000000e+00 : f32
    %20 = vector.broadcast %cst_10 : f32 to vector<8x128xf32>
    %21 = arith.addf %20, %19 : vector<8x128xf32>
    %22 = arith.mulf %16, %21 : vector<8x128xf32>
    %c0_11 = arith.constant 0 : index
    %c0_12 = arith.constant 0 : index
    %23 = vector.load %arg8[%c0_11, %c0_12] : memref<8x32xf32, #tpu.memory_space<vmem>>, vector<8x32xf32>
    %c0_13 = arith.constant 0 : index
    %c0_14 = arith.constant 0 : index
    %24 = vector.load %arg5[%c0_13, %c0_14] : memref<128x32xf32, #tpu.memory_space<vmem>>, vector<128x32xf32>
    %cst_15 = arith.constant dense<0.000000e+00> : vector<8x32xf32>
    %25 = tpu.matmul %22, %24, %cst_15 {dimension_numbers = #tpu.dot_dimension_numbers<[1], [0], [0], [1], [0, 0, 1, 1], [], []>} : vector<8x128xf32>, vector<128x32xf32>, vector<8x32xf32> -> vector<8x32xf32>
    %26 = arith.addf %23, %25 : vector<8x32xf32>
    %c0_16 = arith.constant 0 : index
    %c0_17 = arith.constant 0 : index
    %27 = vector.load %arg8[%c0_16, %c0_17] : memref<8x32xf32, #tpu.memory_space<vmem>>, vector<8x32xf32>
    tpu.vector_store %arg8[%c0_16, %c0_17], %26 {strides = array<i32>} : memref<8x32xf32, #tpu.memory_space<vmem>>, vector<8x32xf32>,
    %c1_i32 = arith.constant 1 : i32
    %28 = arith.cmpi eq, %arg1, %c1_i32 : i32
    %29 = arith.extui %28 : i1 to i32
    %c0_i32_18 = arith.constant 0 : i32
    %30 = arith.cmpi ne, %29, %c0_i32_18 : i32
    scf.if %30 {
      %c0_19 = arith.constant 0 : index
      %c0_20 = arith.constant 0 : index
      %31 = vector.load %arg8[%c0_19, %c0_20] : memref<8x32xf32, #tpu.memory_space<vmem>>, vector<8x32xf32>
      %c0_21 = arith.constant 0 : index
      %c0_22 = arith.constant 0 : index
      %32 = vector.load %arg6[%c0_21, %c0_22] : memref<1x32xf32, #tpu.memory_space<vmem>>, vector<1x32xf32>
      %33 = vector.broadcast %32 : vector<1x32xf32> to vector<8x32xf32>
      %34 = arith.addf %31, %33 : vector<8x32xf32>
      %c0_23 = arith.constant 0 : index
      %c0_24 = arith.constant 0 : index
      %35 = vector.load %arg7[%c0_23, %c0_24] : memref<8x32xf32, #tpu.memory_space<vmem>>, vector<8x32xf32>
      tpu.vector_store %arg7[%c0_23, %c0_24], %34 {strides = array<i32>} : memref<8x32xf32, #tpu.memory_space<vmem>>, vector<8x32xf32>,
    } else {
    }
    return
  }
  func.func @transform_0(%arg0: i32, %arg1: i32) -> (i32, i32) {
    %c0_i32 = arith.constant 0 : i32
    %c0_i32_0 = arith.constant 0 : i32
    return %arg0, %c0_i32 : i32, i32
  }
  func.func @transform_1(%arg0: i32, %arg1: i32) -> (i32, i32) {
    %c0_i32 = arith.constant 0 : i32
    %c0_i32_0 = arith.constant 0 : i32
    return %c0_i32, %arg1 : i32, i32
  }
  func.func @transform_2(%arg0: i32, %arg1: i32) -> (i32, i32) {
    %c0_i32 = arith.constant 0 : i32
    %c0_i32_0 = arith.constant 0 : i32
    return %c0_i32, %arg1 : i32, i32
  }
  func.func @transform_3(%arg0: i32, %arg1: i32) -> (i32, i32) {
    %c0_i32 = arith.constant 0 : i32
    %c0_i32_0 = arith.constant 0 : i32
    return %arg1, %c0_i32 : i32, i32
  }
  func.func @transform_4(%arg0: i32, %arg1: i32) -> (i32, i32) {
    %c0_i32 = arith.constant 0 : i32
    %c0_i32_0 = arith.constant 0 : i32
    %c0_i32_1 = arith.constant 0 : i32
    return %c0_i32, %c0_i32_0 : i32, i32
  }
  func.func @transform_5(%arg0: i32, %arg1: i32) -> (i32, i32) {
    %c0_i32 = arith.constant 0 : i32
    %c0_i32_0 = arith.constant 0 : i32
    return %arg0, %c0_i32 : i32, i32
  }
}

</mosaic_0001>

<bundles_post_ra>
// kernel: tpu_custom_call.1
= control target key start
LH: loop header
LB: loop body
LE: loop exit
PB: predicated region body
PF: predicated region fallthrough
CT: control target
= control target key end

     0   :  { %s1220_s0 = inlined_call_operand.vmem [shape: f32[16,32], index: 0, kind: input, shape index: {}]   ;;  %s1221_s1 = inlined_call_operand.vmem [shape: f32[32,256], index: 1, kind: input, shape index: {}]   ;;  %s1222_s2 = inlined_call_operand.vmem [shape: f32[1,256], index: 2, kind: input, shape index: {}]   ;;  %s1223_s3 = inlined_call_operand.vmem [shape: f32[256,32], index: 3, kind: input, shape index: {}]   ;;  %s1224_s4 = inlined_call_operand.vmem [shape: f32[1,32], index: 4, kind: input, shape index: {}]   ;;  %s1225_s5 = inlined_call_operand.hbm [shape: f32[16,32], index: 5, kind: output, shape index: {}]  }
   0x1   :  { %1232 = sst [smem:[#allocation14_spill]] %s1221_s1 }
   0x2   :  { %10 = vsyncpa [#allocation5], 0 }
   0x3   :  { %12 = vsyncpa [#allocation5 + $0x1], 0  ;;  %s987_s18 = smov 0   ;;  %s989_s19 = smov 0  }
   0x4   :  { %s991_s20 = smov 0   ;;  %s993_s21 = smov 0  }
   0x5   :  { %s995_s22 = smov 0   ;;  %s997_s23 = smov 0  }
   0x6   :  { %s999_s24 = smov 0   ;;  %s1001_s25 = smov 0  }
   0x7   :  { %s1003_s26 = smov 0   ;;  %s1005_s27 = smov 0  }
   0x8 LB: > { %1233 = sst [smem:[#allocation7_spill]] %s931_s22  ;;  %s662_s28 = sadd.s32 4294967295, %s951_s27   ;;  %s951_s27 = sphi %s1005_s27, %s18_s27   ;;  %s947_s26 = sphi %s1003_s26, %s1255_s26   ;;  %s943_s25 = sphi %s1001_s25, %s1250_s25   ;;  %s939_s24 = sphi %s999_s24, %s1249_s24   ;;  %s935_s23 = sphi %s997_s23, %s1248_s23   ;;  %s931_s22 = sphi %s995_s22, %s1247_s22   ;;  %s927_s21 = sphi %s993_s21, %s1246_s21   ;;  %s923_s20 = sphi %s991_s20, %s1254_s20   ;;  %s919_s19 = sphi %s989_s19, %s1253_s19   ;;  %s915_s18 = sphi %s987_s18, %s1252_s18  }
   0x9   : > { %1234 = sst [smem:[#allocation8_spill]] %s943_s25  ;;  %s663_s29 = sadd.s32 4294967294, %s951_s27  }
   0xa   : > { %1235 = sst [smem:[#allocation9_spill]] %s947_s26  ;;  %s27_s30 = sadd.s32 1, %s943_s25 }
   0xb   : > { %s30_s6 = sadd.s32 1, %s947_s26  ;;  %p28_p0 = scmp.ge.s32.totalorder %s27_s30, 2 }
   0xc   : > { %s63_s7 = sadd.s32 1, %s931_s22  ;;  %p70_p1 = scmp.ne.s32.totalorder %s931_s22, %s927_s21 }
   0xd   : > { %p71_p2 = scmp.eq.s32.totalorder %s951_s27, 0  ;;  %s1257_s30 = smov (%p28_p0, %s27_s30), 0 }
   0xe   : > { %1236 = sst [smem:[#allocation10_spill]] %s1257_s30  ;;  %s1259_s6 = smov (!%p28_p0, %s30_s6), %s947_s26 }
   0xf   : > { %s60_s8 = ssub.s32 %s943_s25, %s1257_s30  ;;  %p1050_p3 = por %p71_p2, %p70_p1 }
  0x10   : > { %p32_p4 = scmp.ge.s32.totalorder %s1259_s6, 2  ;;  %p61_p5 = scmp.eq.s32.totalorder %s60_s8, 0 }
  0x11   : > { %s162_s10 = sadd.s32 1, %s923_s20  ;;  %p172_p6 = scmp.ne.s32.totalorder %s923_s20, %s919_s19 }
  0x12   : > { %s1261_s6 = smov (%p32_p4, %s1259_s6), 0  ;;  %p173_p7 = scmp.eq.s32.totalorder %s662_s28, 3 }
  0x13   : > { %1238 = sst [smem:[#allocation11_spill]] %s1261_s6  ;;  %s159_s12 = ssub.s32 %s947_s26, %s1261_s6 }
  0x14   : > { %s1060_s11 = scalar_select %p61_p5, %s931_s22, %s63_s7  }
  0x15   : > { %p160_p8 = scmp.eq.s32.totalorder %s159_s12, 0  ;;  %p178_p9 = scmp.ne.s32.totalorder %s919_s19, %s915_s18 }
  0x16   : > { %1239 = sst [smem:[#allocation12_spill]] %s1060_s11  ;;  %p1066_p10 = por %p173_p7, %p172_p6 }
  0x17   : > { %p179_p11 = scmp.eq.s32.totalorder %s663_s29, 3  ;;  %p665_p13 = scmp.ge.s32.totalorder %s951_s27, 4 }
  0x18   : > { %s1071_s14 = scalar_select %p160_p8, %s923_s20, %s162_s10  }
  0x19   : > { %p1073_p12 = por %p179_p11, %p178_p9  ;;  %198 = sbr.rel (%p665_p13) target bundleno = 42 (0x2a), region = 20 }
  0x1a   : > { %1241 = sst [smem:[#allocation13_spill]] %s1071_s14 }
  0x1e   : > { %208 = sbr.rel (!%p1050_p3) target bundleno = 42 (0x2a), region = 28  ;;  %s210_s16 = sand.u32 (%p1050_p3), 1, %s931_s22  }
  0x1f   : > { %s667_s17 = sshll.u32 (%p1050_p3), %s943_s25, 3  ;;  %s666_s28 = sshll.u32 (%p1050_p3), %s210_s16, 5 }
  0x20   : > { %s1243_s1 = sld [smem:[#allocation14_spill]] (%p1050_p3)  ;;  %s212_s10 = scalar_lea.vmem (%p1050_p3), [#allocation3], %s666_s28 }
  0x26   : > { %s214_s29 = scalar_lea.vmem %s1243_s1, %s667_s17 }
  0x27   : > { %v249_v0 = vld [vmem:[%s214_s29] sm:$0xff]  ;;  %v251_v1 = vld [vmem:[%s214_s29 + $0x10] sm:$0xff] }
  0x28   : > { %v253_v2 = vld [vmem:[%s214_s29 + $0x20] sm:$0xff]  ;;  %250 = vst [vmem:[%s212_s10] sm:$0xff] %v249_v0  ;;  %252 = vst [vmem:[%s212_s10 + $0x8] sm:$0xff] %v251_v1  ;;  %v255_v3 = vld [vmem:[%s214_s29 + $0x30] sm:$0xff] }
  0x29   : > { %254 = vst [vmem:[%s212_s10 + $0x10] sm:$0xff] %v253_v2  ;;  %256 = vst [vmem:[%s212_s10 + $0x18] sm:$0xff] %v255_v3 }
  0x2a PF: > { %p668_p0 = scmp.ge.s32.totalorder %s951_s27, 1  ;;  %p276_p1 = scmp.lt.s32.totalorder %s951_s27, 5 }
  0x2c   : > { %p277_p2 = pnand %p668_p0, %p276_p1 }
  0x2d   : > { %s283_s9 = sand.u32 (!%p277_p2), 1, %s927_s21   ;;  %s1228_s12 = sand.u32 (!%p277_p2), 1, %s919_s19  }
  0x2e   : > { %280 = sbr.rel (%p277_p2) target bundleno = 524 (0x20c), region = 74  ;;  %s669_s16 = sshll.u32 (!%p277_p2), %s283_s9, 5 }
  0x2f   : > { %s1091_s17 = sshll.u32 (!%p277_p2), %s1228_s12, 3  ;;  %p322_p3 = scmp.lt.s32.totalorder (!%p277_p2), %s939_s24, 1 }
  0x30   : > { %p326_p4 = scmp.lt.s32.totalorder (!%p277_p2), %s935_s23, 1  ;;  %s672_s28 = sshll.u32 (!%p277_p2), %s935_s23, 4 }
  0x31   : > { %p330_p5 = scmp.lt.s32.totalorder (!%p277_p2), %s672_s28, 31  ;;  %s285_s22 = scalar_lea.vmem (!%p277_p2), [#allocation3], %s669_s16 }
  0x32   : > { %s321_s14 = scalar_lea.vmem (!%p277_p2), [#allocation4], %s1091_s17  ;;  %p674_p6 = scmp.ne.s32.totalorder (!%p277_p2), %s935_s23, 0 }
  0x33   : > { %s323_s7 = scalar_select %p322_p3, %s939_s24, 1 }
  0x34   : > { %s1098_s8 = scalar_select %p326_p4, %s935_s23, 1 }
  0x35   : > { %s671_s29 = sshll.u32 %s323_s7, 3  ;;  %s1263_s28 = smov (!%p330_p5, %s672_s28), 31 }
  0x36   : > { %s325_s6 = scalar_lea.vmem %s1220_s0, %s671_s29  ;;  %s328_s9 = scalar_lea.vmem %s1222_s2, %s1098_s8 }
  0x37   : > { %s673_s12 = sshll.u32 %s1263_s28, 3  ;;  %338 = sbr.rel (%p674_p6) target bundleno = 62 (0x3e), region = 82 }
  0x38   : > { %s1110_s11 = scalar_lea.vmem %s1223_s3, %s673_s12 }
  0x3c   : > { %vm339_vm0 = vcmask 261120   ;;  %v953_v4 = vmov 0.0  }
  0x3d   : > { %340 = vst.msk [vmem:[#allocation2] sm:$0xff] %vm339_vm0, %v953_v4 }
  0x3e PF: > { %v345_v5 = vld [vmem:[%s285_s22 + $0x18] sm:$0xff]  ;;  %v954_v6 = vmov 0.0   ;;  %v344_v7 = vld [vmem:[%s285_s22 + $0x10] sm:$0xff]  ;;  %vm955_vm1 = vmmov 0   ;;  %v343_v8 = vld [vmem:[%s285_s22 + $0x8] sm:$0xff]  ;;  %vm353_vm2 = vcmask 261120  }
  0x3f   : > { %705 = vmatprep.subr.mxu0 %v954_v6  ;;  %713 = vmatprep.mubr.msk.f32.mxu0 %vm955_vm1, %v954_v6  ;;  %v342_v9 = vld [vmem:[%s285_s22] sm:$0xff]  ;;  %v341_v10 = vld [vmem:[%s325_s6] sm:$0xff]  ;;  %v452_v11 = vld [vmem:[%s1110_s11 + $0x78] sm:$0xff]  ;;  %p677_p7 = scmp.ne.s32.totalorder %s935_s23, 1 }
  0x40   : > { %706 = vmatpush3.msra.mxu0 %v345_v5  ;;  %716 = vmatprep.subr.mxu1 %v954_v6  ;;  %v451_v12 = vld [vmem:[%s1110_s11 + $0x70] sm:$0xff]  ;;  %v450_v13 = vld [vmem:[%s1110_s11 + $0x68] sm:$0xff]  ;;  %v449_v14 = vld [vmem:[%s1110_s11 + $0x60] sm:$0xff] }
  0x41   : > { %707 = vmatprep.subr.mxu0 %v954_v6  ;;  %748 = vmatprep.mubr.msk.f32.mxu1 %vm955_vm1, %v954_v6  ;;  %v448_v15 = vld [vmem:[%s1110_s11 + $0x58] sm:$0xff]  ;;  %v447_v16 = vld [vmem:[%s1110_s11 + $0x50] sm:$0xff]  ;;  %v446_v17 = vld [vmem:[%s1110_s11 + $0x48] sm:$0xff] }
  0x42   : > { %708 = vmatpush3.msra.mxu0 %v344_v7  ;;  %717 = vmatpush3.msra.mxu1 %v452_v11  ;;  %v445_v18 = vld [vmem:[%s1110_s11 + $0x40] sm:$0xff]  ;;  %v444_v19 = vld [vmem:[%s1110_s11 + $0x38] sm:$0xff]  ;;  %v443_v20 = vld [vmem:[%s1110_s11 + $0x30] sm:$0xff] }
  0x43   : > { %709 = vmatprep.subr.mxu0 %v954_v6  ;;  %718 = vmatprep.subr.mxu1 %v954_v6  ;;  %v442_v21 = vld [vmem:[%s1110_s11 + $0x28] sm:$0xff]  ;;  %v441_v22 = vld [vmem:[%s1110_s11 + $0x20] sm:$0xff]  ;;  %v440_v23 = vld [vmem:[%s1110_s11 + $0x18] sm:$0xff] }
  0x44   : > { %710 = vmatpush3.msra.mxu0 %v343_v8  ;;  %719 = vmatpush3.msra.mxu1 %v451_v12  ;;  %v439_v24 = vld [vmem:[%s1110_s11 + $0x10] sm:$0xff]  ;;  %v438_v25 = vld [vmem:[%s1110_s11 + $0x8] sm:$0xff]  ;;  %v437_v26 = vld [vmem:[%s1110_s11] sm:$0xff] }
  0x45   : > { %711 = vmatprep.subr.mxu0 %v954_v6  ;;  %720 = vmatprep.subr.mxu1 %v954_v6  ;;  %v675_v27 = vld [vmem:[%s328_s9] ss:$0 sm:$0xff] }
  0x46   : > { %712 = vmatpush3.msra.mxu0 %v342_v9  ;;  %721 = vmatpush3.msra.mxu1 %v450_v13  ;;  %v436_v40 = vld [vmem:[#allocation2] sm:$0xff] }
  0x47   : > { %714 = vmatmul.mubr.msk.f32.vlgmr.msra.gmra.mxu0 %vm353_vm2, %v341_v10  ;;  %722 = vmatprep.subr.mxu1 %v954_v6 }
  0x48   : > { %723 = vmatpush3.msra.mxu1 %v449_v14 }
  0x49   : > { %724 = vmatprep.subr.mxu1 %v954_v6 }
  0x4a   : > { %725 = vmatpush3.msra.mxu1 %v448_v15 }
  0x4b   : > { %726 = vmatprep.subr.mxu1 %v954_v6 }
  0x4c   : > { %727 = vmatpush3.msra.mxu1 %v447_v16 }
  0x4d   : > { %728 = vmatprep.subr.mxu1 %v954_v6 }
  0x4e   : > { %729 = vmatpush3.msra.mxu1 %v446_v17 }
  0x4f   : > { %730 = vmatprep.subr.mxu1 %v954_v6 }
  0x50   : > { %731 = vmatpush3.msra.mxu1 %v445_v18 }
  0x51   : > { %732 = vmatprep.subr.mxu1 %v954_v6 }
  0x52   : > { %733 = vmatpush3.msra.mxu1 %v444_v19 }
  0x53   : > { %734 = vmatprep.subr.mxu1 %v954_v6 }
  0x54   : > { %735 = vmatpush3.msra.mxu1 %v443_v20 }
  0x55   : > { %736 = vmatprep.subr.mxu1 %v954_v6 }
  0x56   : > { %737 = vmatpush3.msra.mxu1 %v442_v21 }
  0x57   : > { %738 = vmatprep.subr.mxu1 %v954_v6 }
  0x58   : > { %739 = vmatpush3.msra.mxu1 %v441_v22 }
  0x59   : > { %740 = vmatprep.subr.mxu1 %v954_v6 }
  0x5a   : > { %741 = vmatpush3.msra.mxu1 %v440_v23 }
  0x5b   : > { %742 = vmatprep.subr.mxu1 %v954_v6 }
  0x5c   : > { %743 = vmatpush3.msra.mxu1 %v439_v24 }
  0x5d   : > { %744 = vmatprep.subr.mxu1 %v954_v6 }
  0x5e   : > { %745 = vmatpush3.msra.mxu1 %v438_v25 }
  0x5f   : > { %746 = vmatprep.subr.mxu1 %v954_v6 }
  0x60   : > { %747 = vmatpush3.msra.mxu1 %v437_v26 }
 0x107   : > { %v423_v28 = vpop.f32.mrf.mxu0 }
 0x108   : > { %v424_v29 = vadd.f32 %v675_v27, %v423_v28 }
 0x109   : > { %v715_v30 = vpop.f32.mrf.mxu0 }
 0x10a   : > { %v427_v31 = vmul.f32 %v424_v29, %v424_v29  ;;  %v431_v37 = vmul.f32 0.5, %v424_v29 }
 0x10c   : > { %v428_v32 = vmul.f32 0.044715, %v427_v31 }
 0x10e   : > { %v429_v33 = vadd.f32 1.0, %v428_v32 }
 0x110   : > { %v430_v34 = vmul.f32 %v429_v33, %v424_v29 }
 0x112   : > { %v432_v35 = vmul.f32 0.7978846, %v430_v34 }
 0x114   : > { %841 = vtanh.f32 %v432_v35 }
 0x121   : > { %v842_v36 = vpop.eup %841 }
 0x122   : > { %v434_v38 = vadd.f32 1.0, %v842_v36 }
 0x124   : > { %v435_v39 = vmul.f32 %v434_v38, %v431_v37 }
 0x126   : > { %749 = vmatmul.mubr.f32.vlgmr.msra.gmra.mxu1 %v435_v39 }
 0x1e5   : > { %528 = sbr.rel (%p677_p7) target bundleno = 500 (0x1f4), region = 86 }
 0x1e6   : > { %v519_v41 = vpop.f32.mrf.mxu1 }
 0x1e7   : > { %v523_v42 = vadd.f32 %v519_v41, %v436_v40 }
 0x1e8   : > { %v750_v43 = vpop.f32.mrf.mxu1 }
 0x1e9   : > { %524 = vst.msk [vmem:[#allocation2] sm:$0xff] %vm353_vm2, %v523_v42 }
 0x1ea   : > { %v678_v45 = vld [vmem:[%s1224_s4] ss:$0 sm:$0xff] }
 0x1f0   : > { %v529_v44 = vld [vmem:[#allocation2] sm:$0xff] }
 0x1f1   : > { %v537_v46 = vadd.f32 %v678_v45, %v529_v44 }
 0x1f3   : > { %538 = vst.msk [vmem:[%s321_s14] sm:$0xff] %vm353_vm2, %v537_v46 }
 0x1f4 PF: > { %s680_s30 = sshll.u32 %s939_s24, 7  ;;  %s553_s12 = sshll.u32 %s321_s14, 4  ;;  %s554_s12 = int_to_ptr.vmem [resolvable:$true] %s553_s12 }
 0x1f5   : > { %s551_s23 = scalar_lea.hbm %s1225_s5, %s680_s30  ;;  %s1244_s16 = sand.u32 1, %s919_s19  }
 0x1f6   : > { %s540_s28 = scalar_lea.sflag [#allocation5], %s1244_s16  ;;  %s843_s7 = scalar_lea.vmem %s554_s12, 128 }
 0x1f7   : > { %p844_p8 = scmp.ne.s32.totalorder %s554_s12, %s843_s7  ;;  %s956_s8 = smov [#allocation4]  }
 0x1f8   : > { %s847_s29 = sshll.u32 %s956_s8, 4  ;;  %s848_s29 = int_to_ptr.vmem [resolvable:$false] %s847_s29 }
 0x1f9   : > { %p845_p9 = pnand %p844_p8, %p1066_p10  ;;  %s849_s10 = scalar_lea.vmem %s848_s29, 256 }
 0x1fa   : > { %p850_p13 = scmp.lt.s32.totalorder %s554_s12, %s848_s29  ;;  %p851_p0 = scmp.lt.s32.totalorder %s849_s10, %s843_s7 }
 0x1fb   : > { %p846_p11 = pneg %p845_p9 }
 0x1fc   : > { %p852_p1 = por %p851_p0, %p850_p13 }
 0x1fe   : > { %p853_p2 = pnand %p852_p1, %p846_p11 }
 0x200   : > { %856 = shalt.err (!%p853_p2)
}
 0x201   : > { %s857_s24 = scalar_lea.hbm %s551_s23, 128  ;;  %s861_s21 = scalar_lea.hbm %s1225_s5, 256 }
 0x202   : > { %p858_p3 = scmp.ne.s32.totalorder %s551_s23, %s857_s24  ;;  %p862_p6 = scmp.lt.s32.totalorder %s551_s23, %s1225_s5 }
 0x203   : > { %p863_p7 = scmp.lt.s32.totalorder %s861_s21, %s857_s24 }
 0x204   : > { %p859_p4 = pnand %p858_p3, %p1066_p10 }
 0x205   : > { %p864_p8 = por %p863_p7, %p862_p6 }
 0x206   : > { %p860_p5 = pneg %p859_p4 }
 0x208   : > { %p865_p9 = pnand %p864_p8, %p860_p5 }
 0x20a   : > { %868 = shalt.err (!%p865_p9)
}
 0x20b   : > { %751 = dma.vmem_to_hbm [thread:$0]  (%p1066_p10), %s554_s12, 128, %s551_s23, %s540_s28  }
 0x20c PF: > { %p757_p11 = scmp.ge.s32.totalorder %s951_s27, 2  ;;  %s565_s22 = sand.u32 1, %s915_s18  }
 0x20d   : > { %s566_s25 = scalar_lea.sflag [#allocation5], %s565_s22 }
 0x20e   : > { %p754_p13 = pnand %p757_p11, %p1073_p12 }
 0x210   : > { %p755_p0 = pneg %p754_p13 }
 0x212   : > { %910 = dma.done.wait (%p755_p0), %s566_s25, 128  }
 0x213   : > { %912 = vsyncadd (%p755_p0), %s566_s25, 4294967168  ;;  %s18_s27 = sadd.s32 1, %s951_s27   ;;  %s1245_s26 = sld [smem:[#allocation13_spill]] }
 0x214   : > { %p15_p1 = scmp.ge.s32.totalorder %s18_s27, 6   ;;  %s1246_s21 = sld [smem:[#allocation7_spill]] }
 0x215   : > { %s1247_s22 = sld [smem:[#allocation12_spill]]  ;;  %s1252_s18 = smov %s919_s19 }
 0x216   : > { %s1248_s23 = sld [smem:[#allocation8_spill]]  ;;  %s1253_s19 = smov %s923_s20 }
 0x217   : > { %s1249_s24 = sld [smem:[#allocation9_spill]] }
 0x218   : > { %s1250_s25 = sld [smem:[#allocation10_spill]] }
 0x219   : > { %s1251_s13 = sld [smem:[#allocation11_spill]]  ;;  %s1254_s20 = smov %s1245_s26 }
 0x21b   :  { %17 = sbr.rel (!%p15_p1) target bundleno = 8 (0x8), region = 135 }
 0x21f   : > { %s1255_s26 = smov %s1251_s13 }
 0x220   :  { %571 = vsyncpa [#allocation5], 1 }
 0x221   :  { %573 = vsyncpa [#allocation5 + $0x1], 1 }

</bundles_post_ra>
